<compile_context>
chip_gen: v5e
topology: v5e:2x2
jax: 0.10.0
libtpu: 0.0.40
codegen_flags: <defaults>
</compile_context>

<pallas_src>
import jax
import jax.numpy as jnp
from jax.experimental import pallas as pl
from jax.experimental.pallas import tpu as pltpu


def _round_up(x, m):
    return (x + m - 1) // m * m


def _pad2d(a, rows, cols):
    return jnp.pad(a, ((0, rows - a.shape[0]), (0, cols - a.shape[1])))


def _simsiam_kernel(x_ref, w1e_ref, b1e_ref, w2e_ref, b2e_ref,
                    w1p_ref, b1p_ref, w2p_ref, b2p_ref,
                    z_ref, p_ref):
    """Fused encoder + predictor (both views in one batch):
         z = relu(x @ W1e + b1e) @ W2e + b2e
         p = relu(z @ W1p + b1p) @ W2p + b2p
       All matmuls accumulate in f32 on the MXU; z never leaves VMEM.
    """
    # --- encoder ---
    h = jnp.dot(x_ref[...], w1e_ref[...], preferred_element_type=jnp.float32)
    h = jnp.maximum(h + b1e_ref[...], 0.0)                 # bias (1,128) broadcast + ReLU (VPU)
    z = jnp.dot(h, w2e_ref[...], preferred_element_type=jnp.float32) + b2e_ref[...]
    z_ref[...] = z.astype(z_ref.dtype)                     # lane-dense (m,128) store
    # --- predictor (consumes z straight from registers/VMEM) ---
    g = jnp.dot(z, w1p_ref[...], preferred_element_type=jnp.float32)
    g = jnp.maximum(g + b1p_ref[...], 0.0)
    p = jnp.dot(g, w2p_ref[...], preferred_element_type=jnp.float32) + b2p_ref[...]
    p_ref[...] = p.astype(p_ref.dtype)


@jax.jit
def _simsiam_forward(x1, x2, enc_params, pred_params):
    n = x1.shape[0]
    x = jnp.concatenate([x1.reshape(n, -1), x2.reshape(n, -1)], axis=0)   # (2n, D_IN)
    m, d_in = x.shape

    w1e, b1e, w2e, b2e = enc_params
    w1p, b1p, w2p, b2p = pred_params
    h_enc, d_z, h_pred = w1e.shape[1], w2e.shape[1], w1p.shape[1]

    # Pad to vreg/MXU geometry: rows -> multiple of 8, features -> multiple of 128.
    m_p      = _round_up(m, 8)
    d_in_p   = _round_up(d_in, 128)
    h_enc_p  = _round_up(h_enc, 128)
    d_z_p    = _round_up(d_z, 128)
    h_pred_p = _round_up(h_pred, 128)

    x_p   = _pad2d(x,   m_p,      d_in_p).astype(jnp.bfloat16)    # bf16 MXU input
    w1e_p = _pad2d(w1e, d_in_p,   h_enc_p).astype(jnp.bfloat16)   # halves W1 DMA bytes
    b1e_p = _pad2d(b1e, 1,        h_enc_p)
    w2e_p = _pad2d(w2e, h_enc_p,  d_z_p)
    b2e_p = _pad2d(b2e, 1,        d_z_p)
    w1p_p = _pad2d(w1p, d_z_p,    h_pred_p)
    b1p_p = _pad2d(b1p, 1,        h_pred_p)
    w2p_p = _pad2d(w2p, h_pred_p, d_z_p)
    b2p_p = _pad2d(b2p, 1,        d_z_p)

    operands = (x_p, w1e_p, b1e_p, w2e_p, b2e_p, w1p_p, b1p_p, w2p_p, b2p_p)

    flops = 2 * m_p * (d_in_p * h_enc_p + h_enc_p * d_z_p
                       + d_z_p * h_pred_p + h_pred_p * d_z_p)
    bytes_accessed = (sum(int(a.size) * a.dtype.itemsize for a in operands)
                      + 2 * m_p * d_z_p * 4)
    cost = pl.CostEstimate(flops=flops, transcendentals=0,
                           bytes_accessed=bytes_accessed)

    full = lambda a: pl.BlockSpec(a.shape, lambda: (0,) * a.ndim)

    z_pad, p_pad = pl.pallas_call(
        _simsiam_kernel,
        out_shape=(jax.ShapeDtypeStruct((m_p, d_z_p), jnp.float32),
                   jax.ShapeDtypeStruct((m_p, d_z_p), jnp.float32)),
        in_specs=[full(a) for a in operands],
        out_specs=(pl.BlockSpec((m_p, d_z_p), lambda: (0, 0)),
                   pl.BlockSpec((m_p, d_z_p), lambda: (0, 0))),
        cost_estimate=cost,
        compiler_params=pltpu.CompilerParams(vmem_limit_bytes=32 * 1024 * 1024),
    )(*operands)

    z = z_pad[:m, :d_z]
    p = p_pad[:m, :d_z]
    return z[:n], z[n:], p[:n], p[n:]


class SimSiamPallas:
    """JAX/Pallas equivalent of the PyTorch SimSiam module (fused forward)."""

    def __init__(self, enc_params, pred_params):
        self.enc_params = enc_params
        self.pred_params = pred_params

    def forward(self, x1, x2):
        return _simsiam_forward(x1, x2, self.enc_params, self.pred_params)

    __call__ = forward


def _init_linear(key, d_in, d_out):
    kw, kb = jax.random.split(key)
    bound = 1.0 / jnp.sqrt(d_in)
    w = jax.random.uniform(kw, (d_in, d_out), jnp.float32, -bound, bound)
    b = jax.random.uniform(kb, (1, d_out), jnp.float32, -bound, bound)
    return w, b


def _ref_forward(x1, x2, enc_params, pred_params):
    """Pure-JAX reference with the same bf16 quantization of (x, W1)."""
    w1e, b1e, w2e, b2e = enc_params
    w1p, b1p, w2p, b2p = pred_params

    def enc(x):
        x = x.reshape(x.shape[0], -1)
        h = jnp.dot(x.astype(jnp.bfloat16), w1e.astype(jnp.bfloat16),
                    preferred_element_type=jnp.float32) + b1e
        h = jnp.maximum(h, 0.0)
        return jnp.dot(h, w2e, preferred_element_type=jnp.float32) + b2e

    def pred(z):
        h = jnp.maximum(jnp.dot(z, w1p, preferred_element_type=jnp.float32) + b1p, 0.0)
        return jnp.dot(h, w2p, preferred_element_type=jnp.float32) + b2p

    z1, z2 = enc(x1), enc(x2)
    return z1, z2, pred(z1), pred(z2)


if __name__ == "__main__":
    key = jax.random.PRNGKey(0)
    k_x1, k_x2, k_e1, k_e2, k_p1, k_p2 = jax.random.split(key, 6)

    # Small shapes: batch=2, channels=4, spatial=16x16 (NCHW input layout).
    N, C, H, W = 2, 4, 16, 16
    D_IN = C * H * W          # 1024
    H_ENC = 128
    D_Z = 64
    H_PRED = 32

    x1 = jax.random.normal(k_x1, (N, C, H, W), jnp.float32)
    x2 = jax.random.normal(k_x2, (N, C, H, W), jnp.float32)

    enc_params = (*_init_linear(k_e1, D_IN, H_ENC), *_init_linear(k_e2, H_ENC, D_Z))
    pred_params = (*_init_linear(k_p1, D_Z, H_PRED), *_init_linear(k_p2, H_PRED, D_Z))

    model = SimSiamPallas(enc_params, pred_params)
    z1, z2, p1, p2 = model.forward(x1, x2)
    jax.block_until_ready((z1, z2, p1, p2))

    assert z1.shape == (N, D_Z) and z2.shape == (N, D_Z)
    assert p1.shape == (N, D_Z) and p2.shape == (N, D_Z)

    # Check all four outputs against a pure-JAX reference using the same
    # bf16 quantization for the first (K=1024) matmul.
    rz1, rz2, rp1, rp2 = _ref_forward(x1, x2, enc_params, pred_params)
    for got, ref in ((z1, rz1), (z2, rz2), (p1, rp1), (p2, rp2)):
        assert jnp.allclose(got, ref, atol=2e-3, rtol=2e-3)

    print("KERNEL_OK")
</pallas_src>

<mosaic_0001>
module attributes {stable_mosaic.version = 11 : i64} {
  func.func @_simsiam_kernel(%arg0: memref<8x1024xbf16, #tpu.memory_space<vmem>>, %arg1: memref<1024x128xbf16, #tpu.memory_space<vmem>>, %arg2: memref<1x128xf32, #tpu.memory_space<vmem>>, %arg3: memref<128x128xf32, #tpu.memory_space<vmem>>, %arg4: memref<1x128xf32, #tpu.memory_space<vmem>>, %arg5: memref<128x128xf32, #tpu.memory_space<vmem>>, %arg6: memref<1x128xf32, #tpu.memory_space<vmem>>, %arg7: memref<128x128xf32, #tpu.memory_space<vmem>>, %arg8: memref<1x128xf32, #tpu.memory_space<vmem>>, %arg9: memref<8x128xf32, #tpu.memory_space<vmem>>, %arg10: memref<8x128xf32, #tpu.memory_space<vmem>>) attributes {dimension_semantics = [], scalar_prefetch = 0 : i64, scratch_operands = 0 : i64, tpu.core_type = #tpu.core_type<tc>} {
    %c0 = arith.constant 0 : index
    %c0_0 = arith.constant 0 : index
    %0 = vector.load %arg0[%c0, %c0_0] : memref<8x1024xbf16, #tpu.memory_space<vmem>>, vector<8x1024xbf16>
    %c0_1 = arith.constant 0 : index
    %c0_2 = arith.constant 0 : index
    %1 = vector.load %arg1[%c0_1, %c0_2] : memref<1024x128xbf16, #tpu.memory_space<vmem>>, vector<1024x128xbf16>
    %cst = arith.constant dense<0.000000e+00> : vector<8x128xf32>
    %2 = tpu.matmul %0, %1, %cst {dimension_numbers = #tpu.dot_dimension_numbers<[1], [0], [0], [1], [0, 0, 1, 1], [], []>} : vector<8x1024xbf16>, vector<1024x128xbf16>, vector<8x128xf32> -> vector<8x128xf32>
    %c0_3 = arith.constant 0 : index
    %c0_4 = arith.constant 0 : index
    %3 = vector.load %arg2[%c0_3, %c0_4] : memref<1x128xf32, #tpu.memory_space<vmem>>, vector<1x128xf32>
    %4 = vector.broadcast %3 : vector<1x128xf32> to vector<8x128xf32>
    %5 = arith.addf %2, %4 : vector<8x128xf32>
    %cst_5 = arith.constant 0.000000e+00 : f32
    %6 = vector.broadcast %cst_5 : f32 to vector<8x128xf32>
    %7 = arith.maximumf %5, %6 : vector<8x128xf32>
    %c0_6 = arith.constant 0 : index
    %c0_7 = arith.constant 0 : index
    %8 = vector.load %arg3[%c0_6, %c0_7] : memref<128x128xf32, #tpu.memory_space<vmem>>, vector<128x128xf32>
    %cst_8 = arith.constant dense<0.000000e+00> : vector<8x128xf32>
    %9 = tpu.matmul %7, %8, %cst_8 {dimension_numbers = #tpu.dot_dimension_numbers<[1], [0], [0], [1], [0, 0, 1, 1], [], []>} : vector<8x128xf32>, vector<128x128xf32>, vector<8x128xf32> -> vector<8x128xf32>
    %c0_9 = arith.constant 0 : index
    %c0_10 = arith.constant 0 : index
    %10 = vector.load %arg4[%c0_9, %c0_10] : memref<1x128xf32, #tpu.memory_space<vmem>>, vector<1x128xf32>
    %11 = vector.broadcast %10 : vector<1x128xf32> to vector<8x128xf32>
    %12 = arith.addf %9, %11 : vector<8x128xf32>
    %c0_11 = arith.constant 0 : index
    %c0_12 = arith.constant 0 : index
    %13 = vector.load %arg9[%c0_11, %c0_12] : memref<8x128xf32, #tpu.memory_space<vmem>>, vector<8x128xf32>
    tpu.vector_store %arg9[%c0_11, %c0_12], %12 {strides = array<i32>} : memref<8x128xf32, #tpu.memory_space<vmem>>, vector<8x128xf32>,
    %c0_13 = arith.constant 0 : index
    %c0_14 = arith.constant 0 : index
    %14 = vector.load %arg5[%c0_13, %c0_14] : memref<128x128xf32, #tpu.memory_space<vmem>>, vector<128x128xf32>
    %cst_15 = arith.constant dense<0.000000e+00> : vector<8x128xf32>
    %15 = tpu.matmul %12, %14, %cst_15 {dimension_numbers = #tpu.dot_dimension_numbers<[1], [0], [0], [1], [0, 0, 1, 1], [], []>} : vector<8x128xf32>, vector<128x128xf32>, vector<8x128xf32> -> vector<8x128xf32>
    %c0_16 = arith.constant 0 : index
    %c0_17 = arith.constant 0 : index
    %16 = vector.load %arg6[%c0_16, %c0_17] : memref<1x128xf32, #tpu.memory_space<vmem>>, vector<1x128xf32>
    %17 = vector.broadcast %16 : vector<1x128xf32> to vector<8x128xf32>
    %18 = arith.addf %15, %17 : vector<8x128xf32>
    %cst_18 = arith.constant 0.000000e+00 : f32
    %19 = vector.broadcast %cst_18 : f32 to vector<8x128xf32>
    %20 = arith.maximumf %18, %19 : vector<8x128xf32>
    %c0_19 = arith.constant 0 : index
    %c0_20 = arith.constant 0 : index
    %21 = vector.load %arg7[%c0_19, %c0_20] : memref<128x128xf32, #tpu.memory_space<vmem>>, vector<128x128xf32>
    %cst_21 = arith.constant dense<0.000000e+00> : vector<8x128xf32>
    %22 = tpu.matmul %20, %21, %cst_21 {dimension_numbers = #tpu.dot_dimension_numbers<[1], [0], [0], [1], [0, 0, 1, 1], [], []>} : vector<8x128xf32>, vector<128x128xf32>, vector<8x128xf32> -> vector<8x128xf32>
    %c0_22 = arith.constant 0 : index
    %c0_23 = arith.constant 0 : index
    %23 = vector.load %arg8[%c0_22, %c0_23] : memref<1x128xf32, #tpu.memory_space<vmem>>, vector<1x128xf32>
    %24 = vector.broadcast %23 : vector<1x128xf32> to vector<8x128xf32>
    %25 = arith.addf %22, %24 : vector<8x128xf32>
    %c0_24 = arith.constant 0 : index
    %c0_25 = arith.constant 0 : index
    %26 = vector.load %arg10[%c0_24, %c0_25] : memref<8x128xf32, #tpu.memory_space<vmem>>, vector<8x128xf32>
    tpu.vector_store %arg10[%c0_24, %c0_25], %25 {strides = array<i32>} : memref<8x128xf32, #tpu.memory_space<vmem>>, vector<8x128xf32>,
    return
  }
}

</mosaic_0001>

<bundles_post_ra>
// kernel: _simsiam_forward.1
= control target key start
LH: loop header
LB: loop body
LE: loop exit
PB: predicated region body
PF: predicated region fallthrough
CT: control target
= control target key end

     0   :  { %s1563_s1 = inlined_call_operand.vmem [shape: bf16[1024,128], index: 1, kind: input, shape index: {}]   ;;  %s1564_s2 = inlined_call_operand.vmem [shape: f32[1,128], index: 2, kind: input, shape index: {}]   ;;  %s1565_s0 = inlined_call_operand.vmem [shape: bf16[8,1024], index: 0, kind: input, shape index: {}]   ;;  %s1566_s4 = inlined_call_operand.vmem [shape: f32[1,128], index: 4, kind: input, shape index: {}]   ;;  %s1567_s3 = inlined_call_operand.vmem [shape: f32[128,128], index: 3, kind: input, shape index: {}]   ;;  %s1568_s5 = inlined_call_operand.vmem [shape: f32[128,128], index: 5, kind: input, shape index: {}]   ;;  %s1569_s6 = inlined_call_operand.vmem [shape: f32[1,128], index: 6, kind: input, shape index: {}]   ;;  %s1570_s7 = inlined_call_operand.vmem [shape: f32[128,128], index: 7, kind: input, shape index: {}]   ;;  %s1571_s9 = inlined_call_operand.vmem [shape: f32[8,128], index: 9, kind: output, shape index: {0}]   ;;  %s1572_s8 = inlined_call_operand.vmem [shape: f32[1,128], index: 8, kind: input, shape index: {}]   ;;  %s1573_s10 = inlined_call_operand.vmem [shape: f32[8,128], index: 10, kind: output, shape index: {1}]  }
   0x1   :  { %v1081_v0 = vld [vmem:[%s1563_s1 + $0x38] sm:$0xff]  ;;  %v1080_v4 = vld [vmem:[%s1563_s1 + $0x30] sm:$0xff]  ;;  %v1079_v8 = vld [vmem:[%s1563_s1 + $0x28] sm:$0xff] }
   0x2   :  { %v1089_v1 = vld [vmem:[%s1563_s1 + $0x78] sm:$0xff]  ;;  %582 = vmatpush.bf16.msra.mxu0 %v1081_v0  ;;  %v1088_v5 = vld [vmem:[%s1563_s1 + $0x70] sm:$0xff]  ;;  %v1087_v9 = vld [vmem:[%s1563_s1 + $0x68] sm:$0xff] }
   0x3   :  { %v1097_v2 = vld [vmem:[%s1563_s1 + $0xb8] sm:$0xff]  ;;  %595 = vmatpush.bf16.msra.mxu1 %v1089_v1  ;;  %v1096_v6 = vld [vmem:[%s1563_s1 + $0xb0] sm:$0xff]  ;;  %v1095_v10 = vld [vmem:[%s1563_s1 + $0xa8] sm:$0xff] }
   0x4   :  { %v1105_v3 = vld [vmem:[%s1563_s1 + $0xf8] sm:$0xff]  ;;  %608 = vmatpush.bf16.msra.mxu2 %v1097_v2  ;;  %v1104_v7 = vld [vmem:[%s1563_s1 + $0xf0] sm:$0xff]  ;;  %v1103_v11 = vld [vmem:[%s1563_s1 + $0xe8] sm:$0xff] }
   0x5   :  { %621 = vmatpush.bf16.msra.mxu3 %v1105_v3  ;;  %v1078_v12 = vld [vmem:[%s1563_s1 + $0x20] sm:$0xff]  ;;  %v1077_v16 = vld [vmem:[%s1563_s1 + $0x18] sm:$0xff]  ;;  %v1076_v20 = vld [vmem:[%s1563_s1 + $0x10] sm:$0xff] }
   0x6   :  { %583 = vmatpush.bf16.msra.mxu0 %v1080_v4  ;;  %v1086_v13 = vld [vmem:[%s1563_s1 + $0x60] sm:$0xff]  ;;  %v1085_v17 = vld [vmem:[%s1563_s1 + $0x58] sm:$0xff]  ;;  %v1084_v21 = vld [vmem:[%s1563_s1 + $0x50] sm:$0xff] }
   0x7   :  { %596 = vmatpush.bf16.msra.mxu1 %v1088_v5  ;;  %v1094_v14 = vld [vmem:[%s1563_s1 + $0xa0] sm:$0xff]  ;;  %v1093_v18 = vld [vmem:[%s1563_s1 + $0x98] sm:$0xff]  ;;  %v1092_v22 = vld [vmem:[%s1563_s1 + $0x90] sm:$0xff] }
   0x8   :  { %609 = vmatpush.bf16.msra.mxu2 %v1096_v6  ;;  %v1102_v15 = vld [vmem:[%s1563_s1 + $0xe0] sm:$0xff]  ;;  %v1101_v19 = vld [vmem:[%s1563_s1 + $0xd8] sm:$0xff]  ;;  %v1100_v23 = vld [vmem:[%s1563_s1 + $0xd0] sm:$0xff] }
   0x9   :  { %622 = vmatpush.bf16.msra.mxu3 %v1104_v7  ;;  %v1075_v24 = vld [vmem:[%s1563_s1 + $0x8] sm:$0xff]  ;;  %v34_v29 = vld [vmem:[%s1565_s0] sm:$0xff]  ;;  %v1113_v38 = vld [vmem:[%s1563_s1 + $0x138] sm:$0xff] }
   0xa   :  { %584 = vmatpush.bf16.msra.mxu0 %v1079_v8  ;;  %v1083_v25 = vld [vmem:[%s1563_s1 + $0x48] sm:$0xff]  ;;  %v1074_v30 = vld [vmem:[%s1563_s1] sm:$0xff]  ;;  %v174_v33 = vunpack.c.l.b16 %v34_v29  ;;  %v175_v37 = vunpack.c.h.b16 %v34_v29  ;;  %v1121_v39 = vld [vmem:[%s1563_s1 + $0x178] sm:$0xff] }
   0xb   :  { %597 = vmatpush.bf16.msra.mxu1 %v1087_v9  ;;  %v1091_v26 = vld [vmem:[%s1563_s1 + $0x88] sm:$0xff]  ;;  %v1082_v31 = vld [vmem:[%s1563_s1 + $0x40] sm:$0xff]  ;;  %v1129_v40 = vld [vmem:[%s1563_s1 + $0x1b8] sm:$0xff] }
   0xc   :  { %610 = vmatpush.bf16.msra.mxu2 %v1095_v10  ;;  %v1099_v27 = vld [vmem:[%s1563_s1 + $0xc8] sm:$0xff]  ;;  %v1090_v34 = vld [vmem:[%s1563_s1 + $0x80] sm:$0xff]  ;;  %v1137_v41 = vld [vmem:[%s1563_s1 + $0x1f8] sm:$0xff]  ;;  %v182_v43 = vpack.c.b16 %v174_v33, %v174_v33  ;;  %v183_v45 = vpack.c.b16 %v175_v37, %v175_v37 }
   0xd   :  { %623 = vmatpush.bf16.msra.mxu3 %v1103_v11  ;;  %v35_v28 = vld [vmem:[%s1565_s0 + $0x8] sm:$0xff]  ;;  %v1098_v35 = vld [vmem:[%s1563_s1 + $0xc0] sm:$0xff]  ;;  %v1112_v46 = vld [vmem:[%s1563_s1 + $0x130] sm:$0xff] }
   0xe   :  { %585 = vmatpush.bf16.msra.mxu0 %v1078_v12  ;;  %v176_v32 = vunpack.c.l.b16 %v35_v28  ;;  %v177_v36 = vunpack.c.h.b16 %v35_v28  ;;  %v1120_v47 = vld [vmem:[%s1563_s1 + $0x170] sm:$0xff]  ;;  %v1111_v50 = vld [vmem:[%s1563_s1 + $0x128] sm:$0xff]  ;;  %v1110_v54 = vld [vmem:[%s1563_s1 + $0x120] sm:$0xff] }
   0xf   :  { %598 = vmatpush.bf16.msra.mxu1 %v1086_v13  ;;  %v1128_v48 = vld [vmem:[%s1563_s1 + $0x1b0] sm:$0xff]  ;;  %v1119_v51 = vld [vmem:[%s1563_s1 + $0x168] sm:$0xff]  ;;  %v1118_v55 = vld [vmem:[%s1563_s1 + $0x160] sm:$0xff] }
  0x10   :  { %611 = vmatpush.bf16.msra.mxu2 %v1094_v14  ;;  %v184_v42 = vpack.c.b16 %v176_v32, %v176_v32  ;;  %v185_v44 = vpack.c.b16 %v177_v36, %v177_v36  ;;  %v1136_v49 = vld [vmem:[%s1563_s1 + $0x1f0] sm:$0xff]  ;;  %v1127_v52 = vld [vmem:[%s1563_s1 + $0x1a8] sm:$0xff]  ;;  %v1126_v56 = vld [vmem:[%s1563_s1 + $0x1a0] sm:$0xff] }
  0x11   :  { %624 = vmatpush.bf16.msra.mxu3 %v1102_v15  ;;  %v1135_v53 = vld [vmem:[%s1563_s1 + $0x1e8] sm:$0xff]  ;;  %v1134_v57 = vld [vmem:[%s1563_s1 + $0x1e0] sm:$0xff]  ;;  %v1109_v58 = vld [vmem:[%s1563_s1 + $0x118] sm:$0xff] }
  0x12   :  { %586 = vmatpush.bf16.msra.mxu0 %v1077_v16  ;;  %v1117_v59 = vld [vmem:[%s1563_s1 + $0x158] sm:$0xff]  ;;  %v1108_v62 = vld [vmem:[%s1563_s1 + $0x110] sm:$0xff]  ;;  %v1107_v2 = vld [vmem:[%s1563_s1 + $0x108] sm:$0xff] }
  0x13   :  { %599 = vmatpush.bf16.msra.mxu1 %v1085_v17  ;;  %v1125_v60 = vld [vmem:[%s1563_s1 + $0x198] sm:$0xff]  ;;  %v1116_v63 = vld [vmem:[%s1563_s1 + $0x150] sm:$0xff]  ;;  %v1115_v3 = vld [vmem:[%s1563_s1 + $0x148] sm:$0xff] }
  0x14   :  { %612 = vmatpush.bf16.msra.mxu2 %v1093_v18  ;;  %v1133_v61 = vld [vmem:[%s1563_s1 + $0x1d8] sm:$0xff]  ;;  %v1124_v0 = vld [vmem:[%s1563_s1 + $0x190] sm:$0xff]  ;;  %v1123_v5 = vld [vmem:[%s1563_s1 + $0x188] sm:$0xff] }
  0x15   :  { %625 = vmatpush.bf16.msra.mxu3 %v1101_v19  ;;  %v1132_v1 = vld [vmem:[%s1563_s1 + $0x1d0] sm:$0xff]  ;;  %v1131_v6 = vld [vmem:[%s1563_s1 + $0x1c8] sm:$0xff]  ;;  %v37_v7 = vld [vmem:[%s1565_s0 + $0x18] sm:$0xff] }
  0x16   :  { %587 = vmatpush.bf16.msra.mxu0 %v1076_v20  ;;  %v36_v4 = vld [vmem:[%s1565_s0 + $0x10] sm:$0xff]  ;;  %v1106_v10 = vld [vmem:[%s1563_s1 + $0x100] sm:$0xff]  ;;  %v180_v12 = vunpack.c.l.b16 %v37_v7  ;;  %v181_v13 = vunpack.c.h.b16 %v37_v7  ;;  %v702_v20 = vld [vmem:[%s1567_s3 + $0x78] sm:$0xff] }
  0x17   :  { %600 = vmatpush.bf16.msra.mxu1 %v1084_v21  ;;  %v178_v8 = vunpack.c.l.b16 %v36_v4  ;;  %v179_v9 = vunpack.c.h.b16 %v36_v4  ;;  %v1114_v11 = vld [vmem:[%s1563_s1 + $0x140] sm:$0xff]  ;;  %v701_v21 = vld [vmem:[%s1567_s3 + $0x70] sm:$0xff]  ;;  %v694_v28 = vld [vmem:[%s1567_s3 + $0x38] sm:$0xff] }
  0x18   :  { %613 = vmatpush.bf16.msra.mxu2 %v1092_v22  ;;  %v1122_v14 = vld [vmem:[%s1563_s1 + $0x180] sm:$0xff]  ;;  %v188_v18 = vpack.c.b16 %v180_v12, %v180_v12  ;;  %v189_v19 = vpack.c.b16 %v181_v13, %v181_v13  ;;  %v700_v22 = vld [vmem:[%s1567_s3 + $0x68] sm:$0xff]  ;;  %v693_v29 = vld [vmem:[%s1567_s3 + $0x30] sm:$0xff] }
  0x19   :  { %626 = vmatpush.bf16.msra.mxu3 %v1100_v23  ;;  %v1130_v15 = vld [vmem:[%s1563_s1 + $0x1c0] sm:$0xff]  ;;  %v186_v16 = vpack.c.b16 %v178_v8, %v178_v8  ;;  %v187_v17 = vpack.c.b16 %v179_v9, %v179_v9  ;;  %v730_v4 = vld [vmem:[%s1568_s5 + $0x10] sm:$0xff]  ;;  %v729_v12 = vld [vmem:[%s1568_s5 + $0x8] sm:$0xff] }
  0x1a   :  { %588 = vmatpush.bf16.msra.mxu0 %v1075_v24  ;;  %v699_v23 = vld [vmem:[%s1567_s3 + $0x60] sm:$0xff]  ;;  %v698_v24 = vld [vmem:[%s1567_s3 + $0x58] sm:$0xff] }
  0x1b   :  { %601 = vmatpush.bf16.msra.mxu1 %v1083_v25  ;;  %v697_v25 = vld [vmem:[%s1567_s3 + $0x50] sm:$0xff]  ;;  %v691_v32 = vld [vmem:[%s1567_s3 + $0x20] sm:$0xff] }
  0x1c   :  { %614 = vmatpush.bf16.msra.mxu2 %v1091_v26  ;;  %v696_v26 = vld [vmem:[%s1567_s3 + $0x48] sm:$0xff]  ;;  %v728_v13 = vld [vmem:[%s1568_s5] sm:$0xff] }
  0x1d   :  { %627 = vmatpush.bf16.msra.mxu3 %v1099_v27  ;;  %v695_v27 = vld [vmem:[%s1567_s3 + $0x40] sm:$0xff] }
  0x1e   :  { %589 = vmatpush.bf16.msra.mxu0 %v1074_v30  ;;  %v692_v30 = vld [vmem:[%s1567_s3 + $0x28] sm:$0xff] }
  0x1f   :  { %602 = vmatpush.bf16.msra.mxu1 %v1082_v31 }
  0x20   :  { %615 = vmatpush.bf16.msra.mxu2 %v1090_v34  ;;  %v690_v34 = vld [vmem:[%s1567_s3 + $0x18] sm:$0xff] }
  0x21   :  { %628 = vmatpush.bf16.msra.mxu3 %v1098_v35  ;;  %590 = vmatmul.bf16.vlgmr.msra.gmra.mxu0 %v182_v43  ;;  %v689_v35 = vld [vmem:[%s1567_s3 + $0x10] sm:$0xff] }
  0x22   :  { %634 = vmatpush.bf16.msrb.mxu0 %v1113_v38  ;;  %603 = vmatmul.bf16.vlgmr.msra.gmra.mxu1 %v183_v45  ;;  %v688_v38 = vld [vmem:[%s1567_s3 + $0x8] sm:$0xff]  ;;  %v742_v43 = vld [vmem:[%s1568_s5 + $0x70] sm:$0xff] }
  0x23   :  { %647 = vmatpush.bf16.msrb.mxu1 %v1121_v39  ;;  %616 = vmatmul.bf16.vlgmr.msra.gmra.mxu2 %v184_v42  ;;  %v743_v42 = vld [vmem:[%s1568_s5 + $0x78] sm:$0xff] }
  0x24   :  { %660 = vmatpush.bf16.msrb.mxu2 %v1129_v40  ;;  %629 = vmatmul.bf16.vlgmr.msra.gmra.mxu3 %v185_v44  ;;  %v1138_v44 = vld [vmem:[%s1564_s2] ss:$0 sm:$0xff] }
  0x25   :  { %673 = vmatpush.bf16.msrb.mxu3 %v1137_v41  ;;  %v687_v41 = vld [vmem:[%s1567_s3] sm:$0xff] }
  0x26   :  { %635 = vmatpush.bf16.msrb.mxu0 %v1112_v46  ;;  %v741_v46 = vld [vmem:[%s1568_s5 + $0x68] sm:$0xff] }
  0x27   :  { %648 = vmatpush.bf16.msrb.mxu1 %v1120_v47 }
  0x28   :  { %661 = vmatpush.bf16.msrb.mxu2 %v1128_v48  ;;  %v740_v48 = vld [vmem:[%s1568_s5 + $0x60] sm:$0xff] }
  0x29   :  { %674 = vmatpush.bf16.msrb.mxu3 %v1136_v49 }
  0x2a   :  { %636 = vmatpush.bf16.msrb.mxu0 %v1111_v50  ;;  %v739_v50 = vld [vmem:[%s1568_s5 + $0x58] sm:$0xff] }
  0x2b   :  { %649 = vmatpush.bf16.msrb.mxu1 %v1119_v51  ;;  %v738_v51 = vld [vmem:[%s1568_s5 + $0x50] sm:$0xff] }
  0x2c   :  { %662 = vmatpush.bf16.msrb.mxu2 %v1127_v52 }
  0x2d   :  { %675 = vmatpush.bf16.msrb.mxu3 %v1135_v53  ;;  %v737_v53 = vld [vmem:[%s1568_s5 + $0x48] sm:$0xff] }
  0x2e   :  { %637 = vmatpush.bf16.msrb.mxu0 %v1110_v54  ;;  %v736_v54 = vld [vmem:[%s1568_s5 + $0x40] sm:$0xff] }
  0x2f   :  { %650 = vmatpush.bf16.msrb.mxu1 %v1118_v55 }
  0x30   :  { %663 = vmatpush.bf16.msrb.mxu2 %v1126_v56  ;;  %v735_v56 = vld [vmem:[%s1568_s5 + $0x38] sm:$0xff] }
  0x31   :  { %676 = vmatpush.bf16.msrb.mxu3 %v1134_v57  ;;  %v734_v57 = vld [vmem:[%s1568_s5 + $0x30] sm:$0xff] }
  0x32   :  { %638 = vmatpush.bf16.msrb.mxu0 %v1109_v58 }
  0x33   :  { %651 = vmatpush.bf16.msrb.mxu1 %v1117_v59 }
  0x34   :  { %664 = vmatpush.bf16.msrb.mxu2 %v1125_v60 }
  0x35   :  { %677 = vmatpush.bf16.msrb.mxu3 %v1133_v61  ;;  %v733_v61 = vld [vmem:[%s1568_s5 + $0x28] sm:$0xff] }
  0x36   :  { %639 = vmatpush.bf16.msrb.mxu0 %v1108_v62 }
  0x37   :  { %652 = vmatpush.bf16.msrb.mxu1 %v1116_v63  ;;  %v732_v63 = vld [vmem:[%s1568_s5 + $0x20] sm:$0xff] }
  0x38   :  { %665 = vmatpush.bf16.msrb.mxu2 %v1124_v0  ;;  %v731_v0 = vld [vmem:[%s1568_s5 + $0x18] sm:$0xff] }
  0x39   :  { %678 = vmatpush.bf16.msrb.mxu3 %v1132_v1 }
  0x3a   :  { %640 = vmatpush.bf16.msrb.mxu0 %v1107_v2 }
  0x3b   :  { %653 = vmatpush.bf16.msrb.mxu1 %v1115_v3 }
  0x3c   :  { %666 = vmatpush.bf16.msrb.mxu2 %v1123_v5 }
  0x3d   :  { %679 = vmatpush.bf16.msrb.mxu3 %v1131_v6 }
  0x3e   :  { %641 = vmatpush.bf16.msrb.mxu0 %v1106_v10 }
  0x3f   :  { %654 = vmatpush.bf16.msrb.mxu1 %v1114_v11 }
  0x40   :  { %667 = vmatpush.bf16.msrb.mxu2 %v1122_v14  ;;  %v784_v14 = vld [vmem:[%s1570_s7 + $0x78] sm:$0xff] }
  0x41   :  { %680 = vmatpush.bf16.msrb.mxu3 %v1130_v15  ;;  %642 = vmatmul.bf16.vlgmr.msrb.gmra.mxu0 %v186_v16  ;;  %v783_v15 = vld [vmem:[%s1570_s7 + $0x70] sm:$0xff]  ;;  %v782_v16 = vld [vmem:[%s1570_s7 + $0x68] sm:$0xff] }
  0x42   :  { %655 = vmatmul.bf16.vlgmr.msrb.gmra.mxu1 %v187_v17  ;;  %707 = vmatpush.msra.mxu0 %v702_v20  ;;  %v781_v17 = vld [vmem:[%s1570_s7 + $0x60] sm:$0xff]  ;;  %v778_v20 = vld [vmem:[%s1570_s7 + $0x48] sm:$0xff] }
  0x43   :  { %668 = vmatmul.bf16.vlgmr.msrb.gmra.mxu2 %v188_v18  ;;  %748 = vmatpush.msra.mxu1 %v743_v42  ;;  %v780_v18 = vld [vmem:[%s1570_s7 + $0x58] sm:$0xff] }
  0x44   :  { %681 = vmatmul.bf16.vlgmr.msrb.gmra.mxu3 %v189_v19  ;;  %708 = vmatpush.msra.mxu0 %v701_v21  ;;  %v779_v19 = vld [vmem:[%s1570_s7 + $0x50] sm:$0xff]  ;;  %v777_v21 = vld [vmem:[%s1570_s7 + $0x40] sm:$0xff] }
  0x45   :  { %749 = vmatpush.msra.mxu1 %v742_v43  ;;  %789 = vmatpush.msra.mxu2 %v784_v14 }
  0x46   :  { %709 = vmatpush.msra.mxu0 %v700_v22  ;;  %v776_v22 = vld [vmem:[%s1570_s7 + $0x38] sm:$0xff] }
  0x47   :  { %750 = vmatpush.msra.mxu1 %v741_v46  ;;  %790 = vmatpush.msra.mxu2 %v783_v15 }
  0x48   :  { %710 = vmatpush.msra.mxu0 %v699_v23  ;;  %v775_v23 = vld [vmem:[%s1570_s7 + $0x30] sm:$0xff] }
  0x49   :  { %751 = vmatpush.msra.mxu1 %v740_v48  ;;  %791 = vmatpush.msra.mxu2 %v782_v16 }
  0x4a   :  { %711 = vmatpush.msra.mxu0 %v698_v24  ;;  %v774_v24 = vld [vmem:[%s1570_s7 + $0x28] sm:$0xff] }
  0x4b   :  { %752 = vmatpush.msra.mxu1 %v739_v50  ;;  %792 = vmatpush.msra.mxu2 %v781_v17 }
  0x4c   :  { %712 = vmatpush.msra.mxu0 %v697_v25  ;;  %v773_v25 = vld [vmem:[%s1570_s7 + $0x20] sm:$0xff] }
  0x4d   :  { %753 = vmatpush.msra.mxu1 %v738_v51  ;;  %793 = vmatpush.msra.mxu2 %v780_v18 }
  0x4e   :  { %713 = vmatpush.msra.mxu0 %v696_v26  ;;  %v772_v26 = vld [vmem:[%s1570_s7 + $0x18] sm:$0xff] }
  0x4f   :  { %754 = vmatpush.msra.mxu1 %v737_v53  ;;  %794 = vmatpush.msra.mxu2 %v779_v19 }
  0x50   :  { %714 = vmatpush.msra.mxu0 %v695_v27  ;;  %v1139_v27 = vld [vmem:[%s1566_s4] ss:$0 sm:$0xff] }
  0x51   :  { %755 = vmatpush.msra.mxu1 %v736_v54  ;;  %795 = vmatpush.msra.mxu2 %v778_v20 }
  0x52   :  { %715 = vmatpush.msra.mxu0 %v694_v28 }
  0x53   :  { %756 = vmatpush.msra.mxu1 %v735_v56  ;;  %796 = vmatpush.msra.mxu2 %v777_v21 }
  0x54   :  { %716 = vmatpush.msra.mxu0 %v693_v29 }
  0x55   :  { %757 = vmatpush.msra.mxu1 %v734_v57  ;;  %797 = vmatpush.msra.mxu2 %v776_v22 }
  0x56   :  { %717 = vmatpush.msra.mxu0 %v692_v30  ;;  %v771_v30 = vld [vmem:[%s1570_s7 + $0x10] sm:$0xff] }
  0x57   :  { %758 = vmatpush.msra.mxu1 %v733_v61  ;;  %798 = vmatpush.msra.mxu2 %v775_v23 }
  0x58   :  { %718 = vmatpush.msra.mxu0 %v691_v32  ;;  %v769_v32 = vld [vmem:[%s1570_s7] sm:$0xff] }
  0x59   :  { %759 = vmatpush.msra.mxu1 %v732_v63  ;;  %799 = vmatpush.msra.mxu2 %v774_v24 }
  0x5a   :  { %719 = vmatpush.msra.mxu0 %v690_v34 }
  0x5b   :  { %760 = vmatpush.msra.mxu1 %v731_v0  ;;  %800 = vmatpush.msra.mxu2 %v773_v25 }
  0x5c   :  { %720 = vmatpush.msra.mxu0 %v689_v35 }
  0x5d   :  { %761 = vmatpush.msra.mxu1 %v730_v4  ;;  %801 = vmatpush.msra.mxu2 %v772_v26 }
  0x5e   :  { %721 = vmatpush.msra.mxu0 %v688_v38 }
  0x5f   :  { %762 = vmatpush.msra.mxu1 %v729_v12  ;;  %802 = vmatpush.msra.mxu2 %v771_v30 }
  0x60   :  { %722 = vmatpush.msra.mxu0 %v687_v41 }
  0x61   :  { %763 = vmatpush.msra.mxu1 %v728_v13 }
  0x9e   :  { %v591_v31 = vpop.f32.mrf.mxu0 }
  0x9f   :  { %v604_v33 = vpop.f32.mrf.mxu1  ;;  %v592_v49 = vadd.f32 %v1138_v44, %v591_v31  ;;  %v770_v31 = vld [vmem:[%s1570_s7 + $0x8] sm:$0xff] }
  0xa0   :  { %803 = vmatpush.msra.mxu2 %v770_v31 }
  0xa1   :  { %v605_v52 = vadd.f32 %v604_v33, %v592_v49  ;;  %v1140_v33 = vld [vmem:[%s1569_s6] ss:$0 sm:$0xff] }
  0xa2   :  { %804 = vmatpush.msra.mxu2 %v769_v32 }
  0xa6   :  { %v617_v36 = vpop.f32.mrf.mxu2  ;;  %v593_v39 = vpop.f32.mrf.mxu0 }
  0xa7   :  { %v630_v37 = vpop.f32.mrf.mxu3  ;;  %v606_v40 = vpop.f32.mrf.mxu1  ;;  %v618_v55 = vadd.f32 %v617_v36, %v605_v52 }
  0xa9   :  { %v631_v58 = vadd.f32 %v630_v37, %v618_v55  ;;  %v1141_v37 = vld [vmem:[%s1572_s8] ss:$0 sm:$0xff] }
  0xae   :  { %v619_v45 = vpop.f32.mrf.mxu2 }
  0xaf   :  { %v632_v47 = vpop.f32.mrf.mxu3 }
  0xbe   :  { %v643_v59 = vpop.f32.mrf.mxu0 }
  0xbf   :  { %v656_v60 = vpop.f32.mrf.mxu1  ;;  %v644_v62 = vadd.f32 %v643_v59, %v631_v58 }
  0xc1   :  { %v657_v1 = vadd.f32 %v656_v60, %v644_v62 }
  0xc6   :  { %v669_v2 = vpop.f32.mrf.mxu2  ;;  %v645_v6 = vpop.f32.mrf.mxu0 }
  0xc7   :  { %v682_v3 = vpop.f32.mrf.mxu3  ;;  %v670_v5 = vadd.f32 %v669_v2, %v657_v1  ;;  %v658_v7 = vpop.f32.mrf.mxu1 }
  0xc9   :  { %v683_v8 = vadd.f32 %v682_v3, %v670_v5 }
  0xcb   :  { %v686_v9 = vmax.f32 %v683_v8, 0.0 }
  0xcd   :  { %723 = vmatmul.f32.vlgmr.msra.gmra.mxu0 %v686_v9 }
  0xce   :  { %v671_v10 = vpop.f32.mrf.mxu2 }
  0xcf   :  { %v684_v11 = vpop.f32.mrf.mxu3 }
 0x14a   :  { %v724_v28 = vpop.f32.mrf.mxu0 }
 0x14b   :  { %v725_v29 = vadd.f32 %v1139_v27, %v724_v28 }
 0x14d   :  { %727 = vst [vmem:[%s1571_s9] sm:$0xff] %v725_v29  ;;  %764 = vmatmul.f32.vlgmr.msra.gmra.mxu1 %v725_v29 }
 0x1ca   :  { %v765_v34 = vpop.f32.mrf.mxu1 }
 0x1cb   :  { %v766_v35 = vadd.f32 %v1140_v33, %v765_v34 }
 0x1cd   :  { %v768_v36 = vmax.f32 %v766_v35, 0.0 }
 0x1cf   :  { %805 = vmatmul.f32.vlgmr.msra.gmra.mxu2 %v768_v36 }
 0x252   :  { %v806_v38 = vpop.f32.mrf.mxu2 }
 0x253   :  { %v807_v39 = vadd.f32 %v1141_v37, %v806_v38 }
 0x255   :  { %809 = vst [vmem:[%s1573_s10] sm:$0xff] %v807_v39 }

</bundles_post_ra>
